<compile_context>
chip_gen: v7x
topology: tpu7x:2x2x1
jax: 0.10.0
libtpu: 0.0.40
codegen_flags: <defaults>
</compile_context>

<pallas_src>
import functools

import jax
import jax.numpy as jnp
from jax.experimental import pallas as pl
from jax.experimental.pallas import tpu as pltpu


def _round_up(x, m):
    return (x + m - 1) // m * m


def _vmem_budget():
    """(per-stripe f32 byte target, vmem_limit_bytes), per TPU generation."""
    try:
        cap = pltpu.get_tpu_info().vmem_capacity_bytes
    except Exception:
        cap = 64 << 20
    if cap >= (96 << 20):            # v5e / v6e: 128 MiB physical VMEM
        return 6 << 20, 80 << 20
    return 4 << 20, 44 << 20         # v7x: 64 MiB per TensorCore


def _conv2d_kernel(w_ref, b_ref, x_ref, halo_ref, o_ref, *, kh, kw, halo):
    """One lane-dense output row stripe of the 2-D cross-correlation.

    w_ref    : (kh*kw,) f32 SMEM   flattened kernel taps
    b_ref    : (1,)     f32 SMEM   scalar bias
    x_ref    : (th, win)   VMEM    main input stripe (rows s*th .. s*th+th)
    halo_ref : (halo, win) VMEM    rows just below the main stripe
    o_ref    : (th, win)   VMEM    output stripe (ragged edges masked by Pallas)
    """
    th, win = o_ref.shape
    top = th - halo                    # sublane-aligned split point (may be 0)

    x_main = x_ref[...]                # native dtype; promoted per tap below
    # Rows needed by the bottom `halo` output rows: last `halo` rows of the
    # main stripe followed by the halo rows.  Only 2*halo rows -> negligible.
    x_tail = jnp.concatenate([x_main[top:, :], halo_ref[...]], axis=0)

    bias = b_ref[0]
    acc_top = jnp.full((top, win), bias, dtype=jnp.float32) if top else None
    acc_bot = jnp.full((halo, win), bias, dtype=jnp.float32)

    # kh/kw are static -> the tap loops fully unroll at trace time.
    for di in range(kh):
        # Row shift via sublane roll (XLU, co-issues with the VPU MACs).
        # Wrapped rows only land at row indices that are sliced off below.
        if top:
            xr_top = x_main if di == 0 else pltpu.roll(x_main, (th - di) % th, axis=0)
            xr_top = xr_top[:top, :]
        xr_bot = x_tail if di == 0 else pltpu.roll(x_tail, 2 * halo - di, axis=0)
        xr_bot = xr_bot[:halo, :]
        for dj in range(kw):
            w = w_ref[di * kw + dj]
            shift = (win - dj) % win   # lane roll; wraps land only in cols >= Wo
            if top:
                xs_top = xr_top if dj == 0 else pltpu.roll(xr_top, shift, axis=1)
                acc_top = acc_top + w * xs_top
            xs_bot = xr_bot if dj == 0 else pltpu.roll(xr_bot, shift, axis=1)
            acc_bot = acc_bot + w * xs_bot

    if top:
        o_ref[:top, :] = acc_top.astype(o_ref.dtype)
    o_ref[top:, :] = acc_bot.astype(o_ref.dtype)


def conv2d(x, weight, bias, *, block_rows=None):
    """Cross-correlate 2-D `x` with `weight` and add scalar `bias`.

    Matches the PyTorch module: output shape (H - kh + 1, W - kw + 1).
    """
    H, W = x.shape
    kh, kw = weight.shape
    Ho, Wo = H - kh + 1, W - kw + 1
    assert Ho >= 1 and Wo >= 1, "kernel larger than input"

    itemsize = x.dtype.itemsize
    sub = max(8, 32 // itemsize)              # sublane packing: f32 8 / bf16 16 / i8 32
    halo = _round_up(max(kh - 1, 1), sub)     # rows of downward halo
    win = _round_up(W, 128)                   # lane-dense block width

    # Stripe height: as big as the per-generation VMEM budget allows, but
    # capped at ~Ho/2 so there are >= 2 stripes (v7x megacore gets both TCs).
    per_block_bytes, vmem_limit = _vmem_budget()
    rows_cap = max(halo, (per_block_bytes // (win * 4)) // halo * halo)
    th = min(rows_cap, _round_up(pl.cdiv(Ho, 2), halo))
    if block_rows is not None:
        th = min(th, _round_up(block_rows, halo))
    th = max(halo, th)
    ns = pl.cdiv(Ho, th)

    w_flat = weight.reshape(-1).astype(jnp.float32)
    b = bias.reshape(-1).astype(jnp.float32)

    # Halo block index (units of `halo` rows), clamped so the block start is
    # always inside the input (non-faulting edge DMA).  When clamping kicks in
    # ((s+1)*th >= H) those rows only feed output rows >= Ho, which Pallas
    # masks on writeback, so reading "wrong" rows there is harmless.
    th_blocks = th // halo
    max_halo_blk = (H - 1) // halo

    def halo_index_map(s):
        return (jnp.minimum((s + 1) * th_blocks, max_halo_blk), 0)

    kernel = functools.partial(_conv2d_kernel, kh=kh, kw=kw, halo=halo)

    return pl.pallas_call(
        kernel,
        out_shape=jax.ShapeDtypeStruct((Ho, Wo), x.dtype),
        grid=(ns,),
        in_specs=[
            pl.BlockSpec(memory_space=pltpu.MemorySpace.SMEM),   # weights
            pl.BlockSpec(memory_space=pltpu.MemorySpace.SMEM),   # bias
            pl.BlockSpec((th, win), lambda s: (s, 0)),           # main stripe
            pl.BlockSpec((halo, win), halo_index_map),           # halo rows
        ],
        out_specs=pl.BlockSpec((th, win), lambda s: (s, 0)),
        compiler_params=pltpu.CompilerParams(
            dimension_semantics=("parallel",),                   # independent stripes
            vmem_limit_bytes=vmem_limit,
        ),
        cost_estimate=pl.CostEstimate(
            flops=2 * kh * kw * Ho * Wo,
            transcendentals=0,
            bytes_accessed=itemsize * (ns * (th + halo) * win + Ho * Wo),
        ),
    )(w_flat, b, x, x)


def _corr2d_ref(x, k):
    """Pure-JAX reference of the PyTorch corr2d (correctness check)."""
    kh, kw = k.shape
    Ho, Wo = x.shape[0] - kh + 1, x.shape[1] - kw + 1
    acc = jnp.zeros((Ho, Wo), jnp.float32)
    for di in range(kh):
        for dj in range(kw):
            acc = acc + k[di, dj] * x[di:di + Ho, dj:dj + Wo]
    return acc


if __name__ == "__main__":
    key = jax.random.PRNGKey(0)
    k1, k2, k3 = jax.random.split(key, 3)

    # Case 1: small shapes consistent with the module (16x16 input, 3x3 kernel)
    x = jax.random.uniform(k1, (16, 16), dtype=jnp.float32)
    weight = jax.random.uniform(k2, (3, 3), dtype=jnp.float32)  # torch.rand(kernel_size)
    bias = jnp.zeros((1,), dtype=jnp.float32)                   # torch.zeros(1)

    y = jax.block_until_ready(conv2d(x, weight, bias))
    y_ref = _corr2d_ref(x, weight) + bias[0]
    assert y.shape == (14, 14)
    assert jnp.allclose(y, y_ref, atol=1e-5, rtol=1e-5)

    # Case 2: multi-stripe grid, halo fetch, edge-block masking, halo clamping.
    x2 = jax.random.uniform(k3, (300, 200), dtype=jnp.float32)
    bias2 = jnp.full((1,), 0.5, dtype=jnp.float32)
    y2_ref = _corr2d_ref(x2, weight) + bias2[0]

    y2 = jax.block_until_ready(conv2d(x2, weight, bias2, block_rows=64))
    assert y2.shape == (298, 198)
    assert jnp.allclose(y2, y2_ref, atol=1e-4, rtol=1e-4)

    # Case 3: default (VMEM-budget-derived) stripe height, ns >= 2 split.
    y3 = jax.block_until_ready(conv2d(x2, weight, bias2))
    assert y3.shape == (298, 198)
    assert jnp.allclose(y3, y2_ref, atol=1e-4, rtol=1e-4)

    print("KERNEL_OK")
</pallas_src>

<mosaic_0001>
module attributes {stable_mosaic.version = 11 : i64} {
  func.func @_conv2d_kernel(%arg0: i32, %arg1: memref<9xf32, #tpu.memory_space<smem>>, %arg2: memref<1xf32, #tpu.memory_space<smem>>, %arg3: memref<8x128xf32, #tpu.memory_space<vmem>>, %arg4: memref<8x128xf32, #tpu.memory_space<vmem>>, %arg5: memref<8x128xf32, #tpu.memory_space<vmem>>) attributes {dimension_semantics = [#tpu.dimension_semantics<parallel>], iteration_bounds = array<i64: 2>, scalar_prefetch = 0 : i64, scratch_operands = 0 : i64, tpu.core_type = #tpu.core_type<tc>, window_params = [{transform_indices = @transform_0, window_bounds = array<i64: 9>}, {transform_indices = @transform_1, window_bounds = array<i64: 1>}, {transform_indices = @transform_2, window_bounds = array<i64: 8, 128>}, {transform_indices = @transform_3, window_bounds = array<i64: 8, 128>}, {transform_indices = @transform_4, window_bounds = array<i64: 8, 128>}]} {
    %c0 = arith.constant 0 : index
    %c0_0 = arith.constant 0 : index
    %0 = vector.load %arg3[%c0, %c0_0] : memref<8x128xf32, #tpu.memory_space<vmem>>, vector<8x128xf32>
    %c0_1 = arith.constant 0 : index
    %c0_2 = arith.constant 0 : index
    %1 = vector.load %arg4[%c0_1, %c0_2] : memref<8x128xf32, #tpu.memory_space<vmem>>, vector<8x128xf32>
    %2 = tpu.concatenate %0, %1 in 0 : vector<8x128xf32>, vector<8x128xf32> -> vector<16x128xf32>
    %c0_3 = arith.constant 0 : index
    %3 = memref.load %arg2[%c0_3] : memref<1xf32, #tpu.memory_space<smem>>
    %4 = vector.broadcast %3 : f32 to vector<8x128xf32>
    %5 = vector.extract_strided_slice %2 {offsets = [0, 0], sizes = [8, 128], strides = [1, 1]} : vector<16x128xf32> to vector<8x128xf32>
    %c0_4 = arith.constant 0 : index
    %6 = memref.load %arg1[%c0_4] : memref<9xf32, #tpu.memory_space<smem>>
    %7 = vector.broadcast %6 : f32 to vector<8x128xf32>
    %8 = arith.mulf %7, %5 : vector<8x128xf32>
    %9 = arith.addf %4, %8 : vector<8x128xf32>
    %c1 = arith.constant 1 : index
    %10 = memref.load %arg1[%c1] : memref<9xf32, #tpu.memory_space<smem>>
    %c127_i32 = arith.constant 127 : i32
    %11 = tpu.dynamic_rotate %5 by %c127_i32 dim 1 : vector<8x128xf32>, i32 -> vector<8x128xf32>
    %12 = vector.broadcast %10 : f32 to vector<8x128xf32>
    %13 = arith.mulf %12, %11 : vector<8x128xf32>
    %14 = arith.addf %9, %13 : vector<8x128xf32>
    %c2 = arith.constant 2 : index
    %15 = memref.load %arg1[%c2] : memref<9xf32, #tpu.memory_space<smem>>
    %c126_i32 = arith.constant 126 : i32
    %16 = tpu.dynamic_rotate %5 by %c126_i32 dim 1 : vector<8x128xf32>, i32 -> vector<8x128xf32>
    %17 = vector.broadcast %15 : f32 to vector<8x128xf32>
    %18 = arith.mulf %17, %16 : vector<8x128xf32>
    %19 = arith.addf %14, %18 : vector<8x128xf32>
    %c15_i32 = arith.constant 15 : i32
    %20 = tpu.dynamic_rotate %2 by %c15_i32 dim 0 : vector<16x128xf32>, i32 -> vector<16x128xf32>
    %21 = vector.extract_strided_slice %20 {offsets = [0, 0], sizes = [8, 128], strides = [1, 1]} : vector<16x128xf32> to vector<8x128xf32>
    %c3 = arith.constant 3 : index
    %22 = memref.load %arg1[%c3] : memref<9xf32, #tpu.memory_space<smem>>
    %23 = vector.broadcast %22 : f32 to vector<8x128xf32>
    %24 = arith.mulf %23, %21 : vector<8x128xf32>
    %25 = arith.addf %19, %24 : vector<8x128xf32>
    %c4 = arith.constant 4 : index
    %26 = memref.load %arg1[%c4] : memref<9xf32, #tpu.memory_space<smem>>
    %c127_i32_5 = arith.constant 127 : i32
    %27 = tpu.dynamic_rotate %21 by %c127_i32_5 dim 1 : vector<8x128xf32>, i32 -> vector<8x128xf32>
    %28 = vector.broadcast %26 : f32 to vector<8x128xf32>
    %29 = arith.mulf %28, %27 : vector<8x128xf32>
    %30 = arith.addf %25, %29 : vector<8x128xf32>
    %c5 = arith.constant 5 : index
    %31 = memref.load %arg1[%c5] : memref<9xf32, #tpu.memory_space<smem>>
    %c126_i32_6 = arith.constant 126 : i32
    %32 = tpu.dynamic_rotate %21 by %c126_i32_6 dim 1 : vector<8x128xf32>, i32 -> vector<8x128xf32>
    %33 = vector.broadcast %31 : f32 to vector<8x128xf32>
    %34 = arith.mulf %33, %32 : vector<8x128xf32>
    %35 = arith.addf %30, %34 : vector<8x128xf32>
    %c14_i32 = arith.constant 14 : i32
    %36 = tpu.dynamic_rotate %2 by %c14_i32 dim 0 : vector<16x128xf32>, i32 -> vector<16x128xf32>
    %37 = vector.extract_strided_slice %36 {offsets = [0, 0], sizes = [8, 128], strides = [1, 1]} : vector<16x128xf32> to vector<8x128xf32>
    %c6 = arith.constant 6 : index
    %38 = memref.load %arg1[%c6] : memref<9xf32, #tpu.memory_space<smem>>
    %39 = vector.broadcast %38 : f32 to vector<8x128xf32>
    %40 = arith.mulf %39, %37 : vector<8x128xf32>
    %41 = arith.addf %35, %40 : vector<8x128xf32>
    %c7 = arith.constant 7 : index
    %42 = memref.load %arg1[%c7] : memref<9xf32, #tpu.memory_space<smem>>
    %c127_i32_7 = arith.constant 127 : i32
    %43 = tpu.dynamic_rotate %37 by %c127_i32_7 dim 1 : vector<8x128xf32>, i32 -> vector<8x128xf32>
    %44 = vector.broadcast %42 : f32 to vector<8x128xf32>
    %45 = arith.mulf %44, %43 : vector<8x128xf32>
    %46 = arith.addf %41, %45 : vector<8x128xf32>
    %c8 = arith.constant 8 : index
    %47 = memref.load %arg1[%c8] : memref<9xf32, #tpu.memory_space<smem>>
    %c126_i32_8 = arith.constant 126 : i32
    %48 = tpu.dynamic_rotate %37 by %c126_i32_8 dim 1 : vector<8x128xf32>, i32 -> vector<8x128xf32>
    %49 = vector.broadcast %47 : f32 to vector<8x128xf32>
    %50 = arith.mulf %49, %48 : vector<8x128xf32>
    %51 = arith.addf %46, %50 : vector<8x128xf32>
    %c0_9 = arith.constant 0 : index
    %c0_10 = arith.constant 0 : index
    %52 = vector.load %arg5[%c0_9, %c0_10] : memref<8x128xf32, #tpu.memory_space<vmem>>, vector<8x128xf32>
    tpu.vector_store %arg5[%c0_9, %c0_10], %51 {strides = array<i32>} : memref<8x128xf32, #tpu.memory_space<vmem>>, vector<8x128xf32>,
    return
  }
  func.func @transform_0(%arg0: i32) -> i32 {
    %c0_i32 = arith.constant 0 : i32
    %c0_i32_0 = arith.constant 0 : i32
    return %c0_i32 : i32
  }
  func.func @transform_1(%arg0: i32) -> i32 {
    %c0_i32 = arith.constant 0 : i32
    %c0_i32_0 = arith.constant 0 : i32
    return %c0_i32 : i32
  }
  func.func @transform_2(%arg0: i32) -> (i32, i32) {
    %c0_i32 = arith.constant 0 : i32
    %c0_i32_0 = arith.constant 0 : i32
    return %arg0, %c0_i32 : i32, i32
  }
  func.func @transform_3(%arg0: i32) -> (i32, i32) {
    %c1_i32 = arith.constant 1 : i32
    %0 = arith.addi %arg0, %c1_i32 : i32
    %c1_i32_0 = arith.constant 1 : i32
    %1 = arith.muli %0, %c1_i32_0 : i32
    %c1_i32_1 = arith.constant 1 : i32
    %2 = arith.minsi %1, %c1_i32_1 : i32
    %c0_i32 = arith.constant 0 : i32
    %c0_i32_2 = arith.constant 0 : i32
    return %2, %c0_i32 : i32, i32
  }
  func.func @transform_4(%arg0: i32) -> (i32, i32) {
    %c0_i32 = arith.constant 0 : i32
    %c0_i32_0 = arith.constant 0 : i32
    return %arg0, %c0_i32 : i32, i32
  }
}

</mosaic_0001>

<bundles_post_ra>
// kernel: tpu_custom_call.1
= control target key start
LH: loop header
LB: loop body
LE: loop exit
PB: predicated region body
PF: predicated region fallthrough
CT: control target
= control target key end

     0   :  { %s1070_s0 = inlined_call_operand.vmem [shape: f32[9], index: 0, kind: input, shape index: {}]   ;;  %s1071_s1 = inlined_call_operand.<no memory space> [shape: f32[1], index: 1, kind: input, shape index: {}]   ;;  %s1072_s2 = inlined_call_operand.hbm [shape: f32[16,16], index: 2, kind: input, shape index: {}]   ;;  %s1073_s3 = inlined_call_operand.hbm [shape: f32[16,16], index: 3, kind: input, shape index: {}]   ;;  %s1074_s4 = inlined_call_operand.hbm [shape: f32[14,14], index: 4, kind: output, shape index: {}]  }
   0x1   :  { %9 = sst [smem:[#allocation2]] %s1071_s1 }
   0x2   :  { %10 = vsyncpa [#allocation6], 0 }
   0x3   :  { %11 = vsyncpa [#allocation4], 0 }
   0x4   :  { %13 = vsyncpa [#allocation4 + $0x1], 0 }
   0x5   :  { %14 = vsyncpa [#allocation9], 0 }
   0x6   :  { %16 = vsyncpa [#allocation9 + $0x1], 0 }
   0x7   :  { %17 = vsyncpa [#allocation5], 0 }
   0x8   :  { %19 = vsyncpa [#allocation5 + $0x1], 0  ;;  %s781_s17 = smov 0   ;;  %s783_s18 = smov 0  }
   0x9   :  { %s785_s19 = smov 0   ;;  %s787_s20 = smov 0  }
   0xa   :  { %s789_s21 = smov 0   ;;  %s791_s22 = smov 0  }
   0xb   :  { %s793_s1 = smov 0  }
   0xc LB: > { %s169_s25 = sshll.u32 %s1070_s0, 4  ;;  %s820_s26 = sadd.s32 4294967295, %s745_s1   ;;  %s745_s1 = sphi %s793_s1, %s1107_s1   ;;  %s741_s22 = sphi %s791_s22, %s1106_s22   ;;  %s737_s21 = sphi %s789_s21, %s1105_s21   ;;  %s733_s20 = sphi %s787_s20, %s1104_s20   ;;  %s729_s19 = sphi %s785_s19, %s1103_s19   ;;  %s725_s18 = sphi %s783_s18, %s1102_s18   ;;  %s721_s17 = sphi %s781_s17, %s1101_s17   ;;  %s170_s25 = int_to_ptr.vmem [resolvable:$true] %s169_s25 }
   0xd   : > { %p460_p0 = scmp.ge.s32.totalorder %s745_s1, 1  ;;  %p1076_p1 = scmp.eq.s32.totalorder %s820_s26, 0 }
   0xe   : > { %p156_p3 = scmp.lt.s32.totalorder %s745_s1, 3  ;;  %s459_s29 = sadd.s32 4294967294, %s745_s1  }
   0xf   : > { %s74_s30 = sadd.s32 1, %s741_s22  ;;  %p81_p8 = scmp.ne.s32.totalorder %s741_s22, %s737_s21 }
  0x10   : > { %p827_p5 = pnand %p460_p0, %p156_p3  ;;  %p1077_p9 = scmp.eq.s32.totalorder %s745_s1, 0 }
  0x11   : > { %s572_s5 = scalar_lea.vmem %s170_s25, 16  ;;  %p580_p0 = scmp.lt.s32.totalorder %s170_s25, %s170_s25 }
  0x12   : > { %p494_p6 = pneg %p827_p5  ;;  %p573_p10 = scmp.ne.s32.totalorder %s170_s25, %s572_s5 }
  0x13   : > { %p581_p3 = scmp.lt.s32.totalorder %s572_s5, %s572_s5 }
  0x14   : > { %p835_p7 = pnand %p494_p6, %p1076_p1 }
  0x15   : > { %p582_p4 = por %p581_p3, %p580_p0 }
  0x16   : > { %p574_p11 = pneg %p835_p7 }
  0x18   : > { %p575_p12 = pnand %p574_p11, %p573_p10 }
  0x1a   : > { %p576_p13 = pneg %p575_p12 }
  0x1c   : > { %p583_p2 = pnand %p582_p4, %p576_p13 }
  0x1e   : > { %586 = shalt.err (!%p583_p2)
}
  0x1f   : > { %s747_s6 = smov [#allocation3]   ;;  %p853_p2 = por %p1077_p9, %p81_p8 }
  0x20   : > { %497 = dma.vmem_to_smem (!%p835_p7), %s170_s25, 16, %s747_s6, [#allocation6]  }
  0x21   : > { %p87_p4 = scmp.ne.s32.totalorder %s737_s21, %s733_s20  ;;  %p1084_p6 = scmp.eq.s32.totalorder %s820_s26, 1 }
  0x22   : > { %p149_p11 = scmp.eq.s32.totalorder %s459_s29, 1  ;;  %p1075_p7 = scmp.lt.s32.totalorder %s745_s1, 2 }
  0x23   : > { %p864_p10 = por %p1084_p6, %p81_p8  ;;  %p870_p12 = por %p1076_p1, %p87_p4 }
  0x24   : > { %p875_p13 = por %p149_p11, %p87_p4  ;;  %s183_s11 = sand.u32 1, %s741_s22  }
  0x25   : > { %s1085_s8 = scalar_select %p864_p10, 1, 0 }
  0x26   : > { %s1086_s9 = scalar_select %p870_p12, 1, 0 }
  0x27   : > { %s1087_s10 = scalar_select %p875_p13, 1, 0 }
  0x28   : > { %s463_s12 = sshll.u32 %s183_s11, 3  ;;  %s464_s13 = sshll.u32 %s745_s1, 7 }
  0x29   : > { %s884_s16 = scalar_lea.hbm %s1072_s2, %s464_s13  ;;  %s187_s23 = scalar_lea.vmem [#allocation7], %s463_s12 }
  0x2a   : > { %s194_s24 = sshll.u32 %s187_s23, 4  ;;  %p892_p8 = pnand %p1075_p7, %p853_p2  ;;  %s886_s24 = int_to_ptr.vmem [resolvable:$true] %s194_s24 }
  0x2b   : > { %s184_s28 = scalar_lea.sflag [#allocation4], %s183_s11  ;;  %s587_s29 = scalar_lea.hbm %s884_s16, 128 }
  0x2c   : > { %p588_p0 = scmp.ne.s32.totalorder %s884_s16, %s587_s29  ;;  %p589_p3 = pneg %p892_p8 }
  0x2d   : > { %s592_s7 = scalar_lea.hbm %s1072_s2, 256  ;;  %p593_p2 = scmp.lt.u32.totalorder %s884_s16, %s1072_s2 }
  0x2e   : > { %p590_p4 = pnand %p589_p3, %p588_p0  ;;  %p594_p11 = scmp.lt.u32.totalorder %s592_s7, %s587_s29 }
  0x2f   : > { %p596_p1 = scmp.lt.u32.totalorder %s587_s29, %s884_s16 }
  0x30   : > { %p591_p6 = pneg %p590_p4  ;;  %p595_p7 = por %p594_p11, %p593_p2 }
  0x32   : > { %p597_p9 = por %p596_p1, %p595_p7 }
  0x34   : > { %p598_p13 = pnand %p597_p9, %p591_p6 }
  0x36   : > { %601 = shalt.err (!%p598_p13)
}
  0x37   : > { %s602_s11 = scalar_lea.vmem %s886_s24, 128  ;;  %s748_s14 = smov [#allocation7]  }
  0x38   : > { %p603_p0 = scmp.ne.s32.totalorder %s886_s24, %s602_s11  ;;  %s607_s15 = sshll.u32 %s748_s14, 4  ;;  %s608_s15 = int_to_ptr.vmem [resolvable:$false] %s607_s15 }
  0x39   : > { %s609_s23 = scalar_lea.vmem %s608_s15, 256  ;;  %p610_p12 = scmp.lt.s32.totalorder %s886_s24, %s608_s15 }
  0x3a   : > { %p605_p4 = pnand %p603_p0, %p589_p3  ;;  %p611_p2 = scmp.lt.s32.totalorder %s609_s23, %s602_s11 }
  0x3c   : > { %p606_p10 = pneg %p605_p4  ;;  %p612_p11 = por %p611_p2, %p610_p12 }
  0x3e   : > { %p613_p1 = pnand %p612_p11, %p606_p10 }
  0x40   : > { %616 = shalt.err (!%p613_p1)
}
  0x41   : > { %501 = dma.hbm_to_vmem [thread:$0]  (!%p892_p8), %s884_s16, 128, %s886_s24, %s184_s28  }
  0x42   : > { %s922_s29 = sadd.s32 1, %s745_s1   ;;  %s106_s12 = sadd.s32 1, %s729_s19 }
  0x43   : > { %s71_s25 = ssub.s32 %s745_s1, %s922_s29  ;;  %p98_p9 = scmp.lt.s32.totalorder %s922_s29, 1 }
  0x44   : > { %p72_p10 = scmp.eq.s32.totalorder %s71_s25, 0  ;;  %s100_s5 = sadd.s32 1, %s922_s29 }
  0x45   : > { %s99_s6 = scalar_select %p98_p9, %s922_s29, 1 }
  0x46   : > { %s932_s7 = scalar_select %p72_p10, %s741_s22, %s74_s30  }
  0x47   : > { %p101_p12 = scmp.lt.s32.totalorder %s100_s5, 1  ;;  %p113_p7 = scmp.ne.s32.totalorder %s729_s19, %s725_s18 }
  0x48   : > { %p119_p13 = scmp.ne.s32.totalorder %s725_s18, %s721_s17  ;;  %p1089_p8 = scmp.eq.s32.totalorder %s745_s1, 0 }
  0x49   : > { %s1109_s5 = smov (!%p101_p12, %s100_s5), 1  ;;  %p1090_p6 = scmp.eq.s32.totalorder %s820_s26, 0 }
  0x4a   : > { %p115_p3 = por %p113_p7, %p1089_p8  ;;  %s103_s24 = ssub.s32 %s99_s6, %s1109_s5 }
  0x4b   : > { %p943_p0 = por %p119_p13, %p1090_p6  ;;  %s201_s28 = sand.u32 1, %s729_s19  }
  0x4c   : > { %p104_p4 = scmp.eq.s32.totalorder %s103_s24, 0  ;;  %s465_s13 = sshll.u32 %s201_s28, 3 }
  0x4d   : > { %s1091_s16 = scalar_select %p943_p0, 1, 0 }
  0x4e   : > { %s466_s11 = sshll.u32 %s99_s6, 7  ;;  %s205_s17 = scalar_lea.vmem [#allocation8], %s465_s13 }
  0x4f   : > { %s949_s30 = scalar_select %p104_p4, %s729_s19, %s106_s12  }
  0x50   : > { %s954_s23 = scalar_lea.hbm %s1073_s3, %s466_s11  ;;  %s215_s25 = sshll.u32 %s205_s17, 4  ;;  %s962_s25 = int_to_ptr.vmem [resolvable:$true] %s215_s25 }
  0x51   : > { %p1092_p2 = scmp.lt.s32.totalorder %s745_s1, 2  ;;  %s202_s6 = scalar_lea.sflag [#allocation9], %s201_s28 }
  0x52   : > { %s617_s12 = scalar_lea.hbm %s954_s23, 128  ;;  %s622_s11 = scalar_lea.hbm %s1073_s3, 256 }
  0x53   : > { %p958_p11 = pnand %p1092_p2, %p115_p3  ;;  %p618_p1 = scmp.ne.s32.totalorder %s954_s23, %s617_s12 }
  0x54   : > { %p623_p7 = scmp.lt.u32.totalorder %s954_s23, %s1073_s3  ;;  %p624_p13 = scmp.lt.u32.totalorder %s622_s11, %s617_s12 }
  0x55   : > { %p619_p9 = pneg %p958_p11  ;;  %p626_p3 = scmp.lt.u32.totalorder %s617_s12, %s954_s23 }
  0x56   : > { %p625_p8 = por %p624_p13, %p623_p7 }
  0x57   : > { %p620_p10 = pnand %p619_p9, %p618_p1 }
  0x58   : > { %p627_p6 = por %p626_p3, %p625_p8 }
  0x59   : > { %p621_p12 = pneg %p620_p10 }
  0x5b   : > { %p628_p4 = pnand %p627_p6, %p621_p12 }
  0x5d   : > { %631 = shalt.err (!%p628_p4)
}
  0x5e   : > { %s632_s28 = scalar_lea.vmem %s962_s25, 128  ;;  %s749_s17 = smov [#allocation8]  }
  0x5f   : > { %p633_p2 = scmp.ne.s32.totalorder %s962_s25, %s632_s28  ;;  %s637_s24 = sshll.u32 %s749_s17, 4  ;;  %s638_s24 = int_to_ptr.vmem [resolvable:$false] %s637_s24 }
  0x60   : > { %s639_s13 = scalar_lea.vmem %s638_s24, 256  ;;  %p640_p0 = scmp.lt.s32.totalorder %s962_s25, %s638_s24 }
  0x61   : > { %p635_p1 = pnand %p633_p2, %p619_p9  ;;  %p641_p7 = scmp.lt.s32.totalorder %s639_s13, %s632_s28 }
  0x63   : > { %p636_p10 = pneg %p635_p1  ;;  %p642_p13 = por %p641_p7, %p640_p0 }
  0x65   : > { %p643_p8 = pnand %p642_p13, %p636_p10 }
  0x67   : > { %646 = shalt.err (!%p643_p8)
}
  0x68   : > { %504 = dma.hbm_to_vmem [thread:$0]  (!%p958_p11), %s954_s23, 128, %s962_s25, %s202_s6  }
  0x69   : > { %224 = sbr.rel (%p827_p5) target bundleno = 273 (0x111), region = 36  ;;  %p1094_p9 = scmp.eq.s32.totalorder (!%p827_p5), %s820_s26, 0 }
  0x70   : > { %704 = dma.done.wait (%p1094_p9), [#allocation6], 16   ;;  %p1095_p12 = pmov %p1094_p9 }
  0x71   : > { %s996_s12 = sand.u32 1, %s737_s21   ;;  %p1096_p0 = scmp.ne.s32.totalorder %s1086_s9, 0 }
  0x72   : > { %706 = vsyncadd (%p1095_p12), [#allocation6], 4294967280  ;;  %s469_s5 = sshll.u32 %s996_s12, 3  ;;  %s231_s11 = scalar_lea.sflag [#allocation4], %s996_s12 }
  0x73   : > { %s234_s23 = scalar_lea.vmem [#allocation7], %s469_s5 }
  0x74   : > { %708 = dma.done.wait (%p1096_p0), %s231_s11, 128  }
  0x75   : > { %710 = vsyncadd (%p1096_p0), %s231_s11, 4294967168  ;;  %s239_s27 = sand.u32 1, %s725_s18   ;;  %p1097_p5 = scmp.ne.s32.totalorder %s1091_s16, 0 }
  0x76   : > { %s470_s25 = sshll.u32 %s239_s27, 3  ;;  %s240_s6 = scalar_lea.sflag [#allocation9], %s239_s27 }
  0x77   : > { %s243_s14 = scalar_lea.vmem [#allocation8], %s470_s25 }
  0x78   : > { %712 = dma.done.wait (%p1097_p5), %s240_s6, 128  }
  0x79   : > { %714 = vsyncadd (%p1097_p5), %s240_s6, 4294967168 }
  0x7a   : > { %248 = sfence }
  0x7b   : > { %v277_v0 = vld [vmem:[%s234_s23] sm:$0xff]  ;;  %v278_v1 = vld [vmem:[%s243_s14] sm:$0xff]  ;;  %v299_v2 = vlaneseq  ;;  %s750_s15 = smov 127   ;;  %s751_s9 = smov 126  }
  0x7c   : > { %286 = vrot.lane.b32.xlu0 %v277_v0, %s750_s15  ;;  %v297_v3 = vrot.slane %v277_v0, 1  ;;  %v298_v4 = vrot.slane %v278_v1, 1  ;;  %v319_v6 = vrot.slane %v277_v0, 2  ;;  %v320_v7 = vrot.slane %v278_v1, 2  ;;  %s281_s16 = sld [smem:[#allocation3]]  ;;  %s472_s17 = sld [smem:[#allocation3 + $0x1]] }
  0x7d   : > { %v300_v5 = vshrl.u32 %v299_v2, 7  ;;  %s279_s28 = sld [smem:[#allocation2]]  ;;  %s474_s24 = sld [smem:[#allocation3 + $0x3]] }
  0x7e   : > { %s473_s13 = sld [smem:[#allocation3 + $0x2]]  ;;  %s475_s11 = sld [smem:[#allocation3 + $0x4]] }
  0x7f   : > { %vm301_vm0 = vcmp.lt.s32.totalorder %v300_v5, 7  ;;  %vm321_vm1 = vcmp.lt.s32.totalorder %v300_v5, 6  ;;  %s476_s23 = sld [smem:[#allocation3 + $0x5]]  ;;  %s477_s27 = sld [smem:[#allocation3 + $0x6]] }
  0x80   : > { %292 = vrot.lane.b32.xlu0 %v277_v0, %s751_s9  ;;  %v302_v8 = vsel %vm301_vm0, %v297_v3, %v298_v4  ;;  %v322_v9 = vsel %vm321_vm1, %v319_v6, %v320_v7  ;;  %s478_s25 = sld [smem:[#allocation3 + $0x7]]  ;;  %s479_s6 = sld [smem:[#allocation3 + $0x8]] }
  0x81   : > { %308 = vrot.lane.b32.xlu1 %v302_v8, %s750_s15  ;;  %s481_s14 = sshll.u32 %s820_s26, 7  ;;  %p1098_p3 = scmp.ne.s32.totalorder %s1085_s8, 0 }
  0x82   : > { %v282_v10 = vstv %s281_s16  ;;  %v288_v13 = vstv %s472_s17  ;;  %s1017_s17 = scalar_lea.hbm %s1074_s4, %s481_s14  ;;  %s752_s26 = smov [#allocation10]  }
  0x83   : > { %v283_v11 = vmul.f32 %v282_v10, %v277_v0  ;;  %v280_v12 = vstv %s279_s28  ;;  %v304_v17 = vstv %s474_s24  ;;  %s341_s24 = scalar_lea.sflag [#allocation5], %s996_s12 }
  0x84   : > { %328 = vrot.lane.b32.xlu0 %v322_v9, %s750_s15  ;;  %v294_v18 = vstv %s473_s13  ;;  %v305_v20 = vmul.f32 %v304_v17, %v302_v8  ;;  %v310_v24 = vstv %s475_s11  ;;  %s273_s15 = scalar_lea.vmem [#allocation10], %s469_s5  ;;  %s651_s5 = sshll.u32 %s752_s26, 4  ;;  %s652_s5 = int_to_ptr.vmem [resolvable:$false] %s651_s5 }
  0x85   : > { %314 = vrot.lane.b32.xlu1 %v302_v8, %s751_s9  ;;  %v284_v15 = vadd.f32 %v283_v11, %v280_v12  ;;  %v316_v26 = vstv %s476_s23  ;;  %v324_v27 = vstv %s477_s27  ;;  %s653_s11 = scalar_lea.vmem %s652_s5, 256 }
  0x86   : > { %v330_v32 = vstv %s478_s25  ;;  %v325_v34 = vmul.f32 %v324_v27, %v322_v9  ;;  %v336_v36 = vstv %s479_s6 }
  0x89   : > { %334 = vrot.lane.b32.xlu1 %v322_v9, %s751_s9  ;;  %s354_s9 = sshll.u32 %s273_s15, 4  ;;  %s1019_s9 = int_to_ptr.vmem [resolvable:$true] %s354_s9 }
  0x8a   : > { %s647_s13 = scalar_lea.vmem %s1019_s9, 128  ;;  %p654_p2 = scmp.lt.s32.totalorder %s1019_s9, %s652_s5 }
  0x8b   : > { %p648_p11 = scmp.ne.s32.totalorder %s1019_s9, %s647_s13  ;;  %p655_p1 = scmp.lt.s32.totalorder %s653_s11, %s647_s13 }
  0x8d   : > { %p649_p6 = pnand %p648_p11, %p1098_p3  ;;  %p656_p10 = por %p655_p1, %p654_p2 }
  0x8f   : > { %p650_p4 = pneg %p649_p6 }
  0x91   : > { %p657_p7 = pnand %p656_p10, %p650_p4 }
  0xee   : > { %v287_v14 = vpop.permute.xlu0 %286 }
  0xef   : > { %v289_v16 = vmul.f32 %v288_v13, %v287_v14 }
  0xf1   : > { %v290_v21 = vadd.f32 %v289_v16, %v284_v15 }
  0xf2   : > { %v293_v19 = vpop.permute.xlu0 %292 }
  0xf3   : > { %v295_v22 = vmul.f32 %v294_v18, %v293_v19  ;;  %v309_v23 = vpop.permute.xlu1 %308 }
  0xf4   : > { %v311_v29 = vmul.f32 %v310_v24, %v309_v23 }
  0xf5   : > { %v296_v25 = vadd.f32 %v295_v22, %v290_v21 }
  0xf6   : > { %v329_v33 = vpop.permute.xlu0 %328 }
  0xf7   : > { %v306_v28 = vadd.f32 %v305_v20, %v296_v25  ;;  %v315_v30 = vpop.permute.xlu1 %314  ;;  %v331_v38 = vmul.f32 %v330_v32, %v329_v33 }
  0xf8   : > { %v317_v31 = vmul.f32 %v316_v26, %v315_v30 }
  0xf9   : > { %v312_v35 = vadd.f32 %v311_v29, %v306_v28 }
  0xfb   : > { %v318_v37 = vadd.f32 %v317_v31, %v312_v35  ;;  %v335_v39 = vpop.permute.xlu1 %334 }
  0xfc   : > { %v337_v41 = vmul.f32 %v336_v36, %v335_v39 }
  0xfd   : > { %v326_v40 = vadd.f32 %v325_v34, %v318_v37 }
  0xff   : > { %v332_v42 = vadd.f32 %v331_v38, %v326_v40 }
 0x101   : > { %v338_v43 = vadd.f32 %v337_v41, %v332_v42 }
 0x103   : > { %339 = vst [vmem:[%s273_s15] sm:$0xff] %v338_v43 }
 0x104   : > { %660 = shalt.err (!%p657_p7)
}
 0x105   : > { %s661_s12 = scalar_lea.hbm %s1017_s17, 128  ;;  %s665_s25 = scalar_lea.hbm %s1074_s4, 256 }
 0x106   : > { %p662_p13 = scmp.ne.s32.totalorder %s1017_s17, %s661_s12  ;;  %p666_p12 = scmp.lt.u32.totalorder %s1017_s17, %s1074_s4 }
 0x107   : > { %p667_p0 = scmp.lt.u32.totalorder %s665_s25, %s661_s12  ;;  %p669_p11 = scmp.lt.u32.totalorder %s661_s12, %s1017_s17 }
 0x108   : > { %p663_p8 = pnand %p662_p13, %p1098_p3 }
 0x109   : > { %p668_p5 = por %p667_p0, %p666_p12 }
 0x10a   : > { %p664_p9 = pneg %p663_p8 }
 0x10b   : > { %p670_p6 = por %p669_p11, %p668_p5 }
 0x10d   : > { %p671_p4 = pnand %p670_p6, %p664_p9 }
 0x10f   : > { %674 = shalt.err (!%p671_p4)
}
 0x110   : > { %492 = dma.vmem_to_hbm [thread:$0]  (%p1098_p3), %s1019_s9, 128, %s1017_s17, %s341_s24  }
 0x111 PF: > { %s366_s15 = sand.u32 1, %s733_s20   ;;  %p1099_p2 = scmp.ne.s32.totalorder %s1087_s10, 0 }
 0x112   : > { %p1100_p1 = scmp.ge.s32.totalorder %s745_s1, 2  ;;  %s367_s16 = scalar_lea.sflag [#allocation5], %s366_s15 }
 0x114   : > { %p506_p10 = pnand %p1100_p1, %p1099_p2 }
 0x116   : > { %716 = dma.done.wait (!%p506_p10), %s367_s16, 128  }
 0x117   : > { %718 = vsyncadd (!%p506_p10), %s367_s16, 4294967168  ;;  %p22_p3 = scmp.ge.s32.totalorder %s922_s29, 4   ;;  %s1101_s17 = smov %s725_s18 }
 0x118   : > { %s1102_s18 = smov %s729_s19  ;;  %s1103_s19 = smov %s949_s30 }
 0x119   : > { %s1104_s20 = smov %s737_s21  ;;  %s1105_s21 = smov %s741_s22 }
 0x11a   : > { %s1106_s22 = smov %s932_s7  ;;  %s1107_s1 = smov %s922_s29 }
 0x11b   :  { %24 = sbr.rel (!%p22_p3) target bundleno = 12 (0xc), region = 99 }
 0x122   :  { %372 = vsyncpa [#allocation4], 1 }
 0x123   :  { %374 = vsyncpa [#allocation4 + $0x1], 1 }
 0x124   :  { %375 = vsyncpa [#allocation9], 1 }
 0x125   :  { %377 = vsyncpa [#allocation9 + $0x1], 1 }
 0x126   :  { %378 = vsyncpa [#allocation5], 1 }
 0x127   :  { %380 = vsyncpa [#allocation5 + $0x1], 1 }
 0x128   :  { %381 = vsyncpa [#allocation6], 1 }
 0x129   :  { %383 = vsyncpa [#allocation6 + $0x1], 1 }

</bundles_post_ra>
